<compile_context>
chip_gen: v5e
topology: v5e:2x2
jax: 0.10.0
libtpu: 0.0.40
codegen_flags: <defaults>
</compile_context>

<pallas_src>
import functools

import jax
import jax.numpy as jnp
from jax.experimental import pallas as pl
from jax.experimental.pallas import tpu as pltpu

IN_DIM = 273
H1, H2, H3, OUT = 64, 32, 16, 1


def _cdiv(a, b):
    return -(-a // b)


def _round_up(n, m):
    return _cdiv(n, m) * m


# ----------------------------------------------------------------------------- kernel
def _mlp_kernel(x_ref,
                w1_ref, b1_ref,
                w2_ref, b2_ref,
                w3_ref, b3_ref,
                w4_ref, b4_ref,
                o_ref):
    """Fused 4-layer MLP + sigmoid on one batch tile (runs entirely in VMEM)."""
    w1 = w1_ref[...]                                                   # (273, 64) f32 or bf16
    x = x_ref[...].astype(w1.dtype)                                    # in-kernel cast (hidden under DMA)

    h = jnp.dot(x, w1, preferred_element_type=jnp.float32)             # (bt, 64) f32 acc
    h = jnp.maximum(h + b1_ref[...], 0.0)

    h = jnp.dot(h, w2_ref[...], preferred_element_type=jnp.float32)    # (bt, 32)
    h = jnp.maximum(h + b2_ref[...], 0.0)

    h = jnp.dot(h, w3_ref[...], preferred_element_type=jnp.float32)    # (bt, 16)
    h = jnp.maximum(h + b3_ref[...], 0.0)

    # Final Linear(16 -> 1) as XLU transpose + VPU weighted sublane reduce.
    # Produces a lane-dense (1, bt) row so the writeback is an unmasked store.
    h_t = jnp.transpose(h)                                             # (16, bt)
    z = jnp.sum(h_t * w4_ref[...], axis=0, keepdims=True) + b4_ref[...]  # (1, bt)

    o_ref[...] = jax.nn.sigmoid(z)                                     # (1, bt)


# ----------------------------------------------------------------------------- wrapper
def _choose_tile(B, block_b):
    """Pick the batch tile. Default: big tiles; >=2 grid steps for medium/large B (v7x megacore)."""
    if block_b is not None:
        return _round_up(min(int(block_b), max(B, 8)), 8)
    target = 4096
    if B <= 256:
        return _round_up(max(B, 8), 8)          # tiny batch: single grid step
    n_steps = max(2, _cdiv(B, target))          # >=2 steps so both v7x TCs get work
    return _round_up(_cdiv(B, n_steps), 8)


def _est_vmem_bytes(bb, x_itemsize, w1_itemsize):
    weights = (IN_DIM * H1 * w1_itemsize + H1 * 4
               + H1 * H2 * 4 + H2 * 4
               + H2 * H3 * 4 + H3 * 4
               + H3 * OUT * 4 + OUT * 4)
    xbuf = 2 * bb * IN_DIM * x_itemsize          # x tile, double-buffered
    obuf = 2 * bb * 4                            # (1, bb) output tile, double-buffered
    live = bb * (IN_DIM * 2                      # in-kernel bf16 copy of x (worst case)
                 + (H1 + H2 + H3) * 4            # activations
                 + H3 * 4 + 8)                   # transpose + output rows
    return 2 * weights + xbuf + obuf + live


@functools.partial(jax.jit, static_argnames=("block_b",))
def mlp_forward(x, params, block_b=None):
    """x: (B, ...) float32 with prod(...) == 273  ->  (B, 1) float32 probabilities."""
    w1, b1, w2, b2, w3, b3, w4, b4 = params
    x = x.reshape(x.shape[0], -1)                # nn.Flatten
    B = x.shape[0]
    assert x.shape[1] == IN_DIM, x.shape

    bb = _choose_tile(B, block_b)
    n_blocks = _cdiv(B, bb)                      # partial edge block masked by Pallas

    # Weights / biases: full-array blocks, resident across the whole grid.
    def whole(shape):
        return pl.BlockSpec(shape, lambda i: (0,) * len(shape))

    est_vmem = _est_vmem_bytes(bb, x.dtype.itemsize, w1.dtype.itemsize)
    vmem_limit = None
    if est_vmem > 12 * 1024 * 1024:              # only raise past the smallest default (v5e 16 MiB)
        vmem_limit = int(min(est_vmem + (8 << 20), 32 * 1024 * 1024))

    out = pl.pallas_call(
        _mlp_kernel,
        out_shape=jax.ShapeDtypeStruct((n_blocks, 1, bb), jnp.float32),
        grid_spec=pltpu.PrefetchScalarGridSpec(
            num_scalar_prefetch=0,
            grid=(n_blocks,),
            in_specs=[
                pl.BlockSpec((bb, IN_DIM), lambda i: (i, 0)),   # raw x batch tile, no pad/cast copy
                whole((IN_DIM, H1)), whole((1, H1)),
                whole((H1, H2)),     whole((1, H2)),
                whole((H2, H3)),     whole((1, H3)),
                whole((H3, OUT)),    whole((1, OUT)),
            ],
            # Lane-dense output: one (1, bb) row per grid step.
            out_specs=pl.BlockSpec((None, 1, bb), lambda i: (i, 0, 0)),
        ),
        compiler_params=pltpu.CompilerParams(
            dimension_semantics=("parallel",),
            vmem_limit_bytes=vmem_limit),
    )(x, w1, b1, w2, b2, w3, b3, w4, b4)

    # (n_blocks, 1, bb) -> (B, 1); flattening preserves sample order, OOB rows sliced off.
    return out.reshape(n_blocks * bb, 1)[:B]


# ----------------------------------------------------------------------------- params
def init_params(key):
    """Deterministic init mimicking torch.nn.Linear default (U(-1/sqrt(fan_in), ..))."""
    dims = [(IN_DIM, H1), (H1, H2), (H2, H3), (H3, OUT)]
    params = []
    for (fan_in, fan_out) in dims:
        key, kw, kb = jax.random.split(key, 3)
        bound = 1.0 / jnp.sqrt(float(fan_in))
        w = jax.random.uniform(kw, (fan_in, fan_out), jnp.float32, -bound, bound)
        b = jax.random.uniform(kb, (1, fan_out), jnp.float32, -bound, bound)
        params += [w, b]
    return tuple(params)


def prepare_params(params, bf16_layer1=True):
    """One-time parameter prep (outside the per-call jit): bf16 layer-1 weight for MXU throughput."""
    w1, b1, w2, b2, w3, b3, w4, b4 = params
    if bf16_layer1:
        w1 = w1.astype(jnp.bfloat16)
    return (w1, b1, w2, b2, w3, b3, w4, b4)


def reference_forward(x, params):
    w1, b1, w2, b2, w3, b3, w4, b4 = params
    x = x.reshape(x.shape[0], -1)
    h = jnp.maximum(x @ w1.astype(jnp.float32) + b1, 0.0)
    h = jnp.maximum(h @ w2 + b2, 0.0)
    h = jnp.maximum(h @ w3 + b3, 0.0)
    return jax.nn.sigmoid(h @ w4 + b4)


# ----------------------------------------------------------------------------- main
if __name__ == "__main__":
    key = jax.random.PRNGKey(0)
    kx, kp = jax.random.split(key)
    params_f32 = init_params(kp)
    params_bf16 = prepare_params(params_f32, bf16_layer1=True)   # hoisted one-time cast

    # 1) Small-batch correctness path (single grid step), full f32, tight tolerance.
    B = 16
    x = jax.random.normal(kx, (B, IN_DIM), jnp.float32)
    ref = reference_forward(x, params_f32)
    out = jax.block_until_ready(mlp_forward(x, params_f32))
    assert out.shape == (B, 1), out.shape
    assert jnp.allclose(out, ref, atol=1e-5, rtol=1e-5), float(jnp.max(jnp.abs(out - ref)))

    # 2) Default path (bf16 layer 1), odd batch exercising the partial-edge-block masking.
    B2 = 100
    x2 = jax.random.normal(kx, (B2, IN_DIM), jnp.float32)
    ref2 = reference_forward(x2, params_f32)
    out2 = jax.block_until_ready(mlp_forward(x2, params_bf16))
    assert out2.shape == (B2, 1), out2.shape
    assert jnp.allclose(out2, ref2, atol=2e-2, rtol=0.0), float(jnp.max(jnp.abs(out2 - ref2)))

    # 3) Multi-step pipelined grid with a partial last tile (600 = 2*256 + 88).
    B3 = 600
    x3 = jax.random.normal(kx, (B3, IN_DIM), jnp.float32)
    ref3 = reference_forward(x3, params_f32)
    out3 = jax.block_until_ready(mlp_forward(x3, params_bf16, block_b=256))
    assert out3.shape == (B3, 1), out3.shape
    assert jnp.allclose(out3, ref3, atol=2e-2, rtol=0.0), float(jnp.max(jnp.abs(out3 - ref3)))

    print("KERNEL_OK")
</pallas_src>

<mosaic_0001>
module attributes {stable_mosaic.version = 11 : i64} {
  func.func @_mlp_kernel(%arg0: i32, %arg1: memref<16x273xf32, #tpu.memory_space<vmem>>, %arg2: memref<273x64xf32, #tpu.memory_space<vmem>>, %arg3: memref<1x64xf32, #tpu.memory_space<vmem>>, %arg4: memref<64x32xf32, #tpu.memory_space<vmem>>, %arg5: memref<1x32xf32, #tpu.memory_space<vmem>>, %arg6: memref<32x16xf32, #tpu.memory_space<vmem>>, %arg7: memref<1x16xf32, #tpu.memory_space<vmem>>, %arg8: memref<16x1xf32, #tpu.memory_space<vmem>>, %arg9: memref<1x1xf32, #tpu.memory_space<vmem>>, %arg10: memref<1x1x16xf32, #tpu.memory_space<vmem>>) attributes {dimension_semantics = [#tpu.dimension_semantics<parallel>], iteration_bounds = array<i64: 1>, scalar_prefetch = 0 : i64, scratch_operands = 0 : i64, tpu.core_type = #tpu.core_type<tc>, window_params = [{transform_indices = @transform_0, window_bounds = array<i64: 16, 273>}, {pipeline_mode = #tpu.pipeline_mode<synchronous>, transform_indices = @transform_1, window_bounds = array<i64: 273, 64>}, {pipeline_mode = #tpu.pipeline_mode<synchronous>, transform_indices = @transform_2, window_bounds = array<i64: 1, 64>}, {pipeline_mode = #tpu.pipeline_mode<synchronous>, transform_indices = @transform_3, window_bounds = array<i64: 64, 32>}, {pipeline_mode = #tpu.pipeline_mode<synchronous>, transform_indices = @transform_4, window_bounds = array<i64: 1, 32>}, {pipeline_mode = #tpu.pipeline_mode<synchronous>, transform_indices = @transform_5, window_bounds = array<i64: 32, 16>}, {pipeline_mode = #tpu.pipeline_mode<synchronous>, transform_indices = @transform_6, window_bounds = array<i64: 1, 16>}, {pipeline_mode = #tpu.pipeline_mode<synchronous>, transform_indices = @transform_7, window_bounds = array<i64: 16, 1>}, {pipeline_mode = #tpu.pipeline_mode<synchronous>, transform_indices = @transform_8, window_bounds = array<i64: 1, 1>}, {transform_indices = @transform_9, window_bounds = array<i64: 1, 1, 16>}]} {
    %c0 = arith.constant 0 : index
    %c0_0 = arith.constant 0 : index
    %0 = vector.load %arg2[%c0, %c0_0] : memref<273x64xf32, #tpu.memory_space<vmem>>, vector<273x64xf32>
    %c0_1 = arith.constant 0 : index
    %c0_2 = arith.constant 0 : index
    %1 = vector.load %arg1[%c0_1, %c0_2] : memref<16x273xf32, #tpu.memory_space<vmem>>, vector<16x273xf32>
    %cst = arith.constant dense<0.000000e+00> : vector<16x64xf32>
    %2 = tpu.matmul %1, %0, %cst {dimension_numbers = #tpu.dot_dimension_numbers<[1], [0], [0], [1], [0, 0, 1, 1], [], []>} : vector<16x273xf32>, vector<273x64xf32>, vector<16x64xf32> -> vector<16x64xf32>
    %c0_3 = arith.constant 0 : index
    %c0_4 = arith.constant 0 : index
    %3 = vector.load %arg3[%c0_3, %c0_4] : memref<1x64xf32, #tpu.memory_space<vmem>>, vector<1x64xf32>
    %4 = vector.broadcast %3 : vector<1x64xf32> to vector<16x64xf32>
    %5 = arith.addf %2, %4 : vector<16x64xf32>
    %cst_5 = arith.constant 0.000000e+00 : f32
    %6 = vector.broadcast %cst_5 : f32 to vector<16x64xf32>
    %7 = arith.maximumf %5, %6 : vector<16x64xf32>
    %c0_6 = arith.constant 0 : index
    %c0_7 = arith.constant 0 : index
    %8 = vector.load %arg4[%c0_6, %c0_7] : memref<64x32xf32, #tpu.memory_space<vmem>>, vector<64x32xf32>
    %cst_8 = arith.constant dense<0.000000e+00> : vector<16x32xf32>
    %9 = tpu.matmul %7, %8, %cst_8 {dimension_numbers = #tpu.dot_dimension_numbers<[1], [0], [0], [1], [0, 0, 1, 1], [], []>} : vector<16x64xf32>, vector<64x32xf32>, vector<16x32xf32> -> vector<16x32xf32>
    %c0_9 = arith.constant 0 : index
    %c0_10 = arith.constant 0 : index
    %10 = vector.load %arg5[%c0_9, %c0_10] : memref<1x32xf32, #tpu.memory_space<vmem>>, vector<1x32xf32>
    %11 = vector.broadcast %10 : vector<1x32xf32> to vector<16x32xf32>
    %12 = arith.addf %9, %11 : vector<16x32xf32>
    %cst_11 = arith.constant 0.000000e+00 : f32
    %13 = vector.broadcast %cst_11 : f32 to vector<16x32xf32>
    %14 = arith.maximumf %12, %13 : vector<16x32xf32>
    %c0_12 = arith.constant 0 : index
    %c0_13 = arith.constant 0 : index
    %15 = vector.load %arg6[%c0_12, %c0_13] : memref<32x16xf32, #tpu.memory_space<vmem>>, vector<32x16xf32>
    %cst_14 = arith.constant dense<0.000000e+00> : vector<16x16xf32>
    %16 = tpu.matmul %14, %15, %cst_14 {dimension_numbers = #tpu.dot_dimension_numbers<[1], [0], [0], [1], [0, 0, 1, 1], [], []>} : vector<16x32xf32>, vector<32x16xf32>, vector<16x16xf32> -> vector<16x16xf32>
    %c0_15 = arith.constant 0 : index
    %c0_16 = arith.constant 0 : index
    %17 = vector.load %arg7[%c0_15, %c0_16] : memref<1x16xf32, #tpu.memory_space<vmem>>, vector<1x16xf32>
    %18 = vector.broadcast %17 : vector<1x16xf32> to vector<16x16xf32>
    %19 = arith.addf %16, %18 : vector<16x16xf32>
    %cst_17 = arith.constant 0.000000e+00 : f32
    %20 = vector.broadcast %cst_17 : f32 to vector<16x16xf32>
    %21 = arith.maximumf %19, %20 : vector<16x16xf32>
    %22 = tpu.transpose %21, [1, 0] : vector<16x16xf32> -> vector<16x16xf32>
    %c0_18 = arith.constant 0 : index
    %c0_19 = arith.constant 0 : index
    %23 = vector.load %arg8[%c0_18, %c0_19] : memref<16x1xf32, #tpu.memory_space<vmem>>, vector<16x1xf32>
    %24 = vector.broadcast %23 : vector<16x1xf32> to vector<16x16xf32>
    %25 = arith.mulf %22, %24 : vector<16x16xf32>
    %cst_20 = arith.constant dense<0.000000e+00> : vector<16xf32>
    %26 = vector.multi_reduction <add>, %25, %cst_20 [0] : vector<16x16xf32> to vector<16xf32>
    %27 = vector.shape_cast %26 : vector<16xf32> to vector<1x16xf32>
    %c0_21 = arith.constant 0 : index
    %c0_22 = arith.constant 0 : index
    %28 = vector.load %arg9[%c0_21, %c0_22] : memref<1x1xf32, #tpu.memory_space<vmem>>, vector<1x1xf32>
    %29 = vector.broadcast %28 : vector<1x1xf32> to vector<1x16xf32>
    %30 = arith.addf %27, %29 : vector<1x16xf32>
    %31 = arith.negf %30 : vector<1x16xf32>
    %32 = math.exp %31 : vector<1x16xf32>
    %cst_23 = arith.constant 1.000000e+00 : f32
    %33 = vector.broadcast %cst_23 : f32 to vector<1x16xf32>
    %34 = arith.addf %33, %32 : vector<1x16xf32>
    %35 = arith.divf %33, %34 : vector<1x16xf32>
    %c0_24 = arith.constant 0 : index
    %c0_25 = arith.constant 0 : index
    %c0_26 = arith.constant 0 : index
    %36 = vector.load %arg10[%c0_24, %c0_25, %c0_26] : memref<1x1x16xf32, #tpu.memory_space<vmem>>, vector<1x1x16xf32>
    %37 = vector.shape_cast %36 : vector<1x1x16xf32> to vector<1x16xf32>
    %38 = vector.shape_cast %35 : vector<1x16xf32> to vector<1x1x16xf32>
    tpu.vector_store %arg10[%c0_24, %c0_25, %c0_26], %38 {strides = array<i32>} : memref<1x1x16xf32, #tpu.memory_space<vmem>>, vector<1x1x16xf32>,
    return
  }
  func.func @transform_0(%arg0: i32) -> (i32, i32) {
    %c0_i32 = arith.constant 0 : i32
    %c0_i32_0 = arith.constant 0 : i32
    return %arg0, %c0_i32 : i32, i32
  }
  func.func @transform_1(%arg0: i32) -> (i32, i32) {
    %c0_i32 = arith.constant 0 : i32
    %c0_i32_0 = arith.constant 0 : i32
    %c0_i32_1 = arith.constant 0 : i32
    return %c0_i32, %c0_i32_0 : i32, i32
  }
  func.func @transform_2(%arg0: i32) -> (i32, i32) {
    %c0_i32 = arith.constant 0 : i32
    %c0_i32_0 = arith.constant 0 : i32
    %c0_i32_1 = arith.constant 0 : i32
    return %c0_i32, %c0_i32_0 : i32, i32
  }
  func.func @transform_3(%arg0: i32) -> (i32, i32) {
    %c0_i32 = arith.constant 0 : i32
    %c0_i32_0 = arith.constant 0 : i32
    %c0_i32_1 = arith.constant 0 : i32
    return %c0_i32, %c0_i32_0 : i32, i32
  }
  func.func @transform_4(%arg0: i32) -> (i32, i32) {
    %c0_i32 = arith.constant 0 : i32
    %c0_i32_0 = arith.constant 0 : i32
    %c0_i32_1 = arith.constant 0 : i32
    return %c0_i32, %c0_i32_0 : i32, i32
  }
  func.func @transform_5(%arg0: i32) -> (i32, i32) {
    %c0_i32 = arith.constant 0 : i32
    %c0_i32_0 = arith.constant 0 : i32
    %c0_i32_1 = arith.constant 0 : i32
    return %c0_i32, %c0_i32_0 : i32, i32
  }
  func.func @transform_6(%arg0: i32) -> (i32, i32) {
    %c0_i32 = arith.constant 0 : i32
    %c0_i32_0 = arith.constant 0 : i32
    %c0_i32_1 = arith.constant 0 : i32
    return %c0_i32, %c0_i32_0 : i32, i32
  }
  func.func @transform_7(%arg0: i32) -> (i32, i32) {
    %c0_i32 = arith.constant 0 : i32
    %c0_i32_0 = arith.constant 0 : i32
    %c0_i32_1 = arith.constant 0 : i32
    return %c0_i32, %c0_i32_0 : i32, i32
  }
  func.func @transform_8(%arg0: i32) -> (i32, i32) {
    %c0_i32 = arith.constant 0 : i32
    %c0_i32_0 = arith.constant 0 : i32
    %c0_i32_1 = arith.constant 0 : i32
    return %c0_i32, %c0_i32_0 : i32, i32
  }
  func.func @transform_9(%arg0: i32) -> (i32, i32, i32) {
    %c0_i32 = arith.constant 0 : i32
    %c0_i32_0 = arith.constant 0 : i32
    %c0_i32_1 = arith.constant 0 : i32
    return %arg0, %c0_i32, %c0_i32_0 : i32, i32, i32
  }
}

</mosaic_0001>

<bundles_post_ra>
// kernel: mlp_forward.1
= control target key start
LH: loop header
LB: loop body
LE: loop exit
PB: predicated region body
PF: predicated region fallthrough
CT: control target
= control target key end

     0   :  { %s627_s0 = inlined_call_operand.vmem [shape: f32[16,273], index: 0, kind: input, shape index: {}]   ;;  %s628_s1 = inlined_call_operand.vmem [shape: f32[273,64], index: 1, kind: input, shape index: {}]   ;;  %s629_s2 = inlined_call_operand.vmem [shape: f32[1,64], index: 2, kind: input, shape index: {}]   ;;  %s630_s3 = inlined_call_operand.vmem [shape: f32[64,32], index: 3, kind: input, shape index: {}]   ;;  %s631_s4 = inlined_call_operand.vmem [shape: f32[1,32], index: 4, kind: input, shape index: {}]   ;;  %s632_s5 = inlined_call_operand.vmem [shape: f32[32,16], index: 5, kind: input, shape index: {}]   ;;  %s633_s6 = inlined_call_operand.vmem [shape: f32[1,16], index: 6, kind: input, shape index: {}]   ;;  %s634_s7 = inlined_call_operand.vmem [shape: f32[16,1], index: 7, kind: input, shape index: {}]   ;;  %s635_s8 = inlined_call_operand.<no memory space> [shape: f32[1,1], index: 8, kind: input, shape index: {}]   ;;  %s636_s9 = inlined_call_operand.hbm [shape: f32[1,1,16], index: 9, kind: output, shape index: {}]  }
   0x1   :  { %v14_v0 = vstv %s635_s8 }
   0x2   :  { %15 = vst [vmem:[#allocation2] sm:$0x1] %v14_v0 }
   0x3   :  { %v50_v1 = vld [vmem:[%s628_s1 + $0x78] sm:$0xff]  ;;  %v49_v2 = vld [vmem:[%s628_s1 + $0x70] sm:$0xff]  ;;  %v48_v5 = vld [vmem:[%s628_s1 + $0x68] sm:$0xff]  ;;  %vm87_vm0 = vcmask 1040384   ;;  %vm80_vm1 = vcmask 138240  }
   0x4   :  { %v66_v3 = vld [vmem:[%s628_s1 + $0xf8] sm:$0xff]  ;;  %91 = vmatpush.msra.mxu0 %v50_v1  ;;  %v65_v4 = vld [vmem:[%s628_s1 + $0xf0] sm:$0xff]  ;;  %v64_v6 = vld [vmem:[%s628_s1 + $0xe8] sm:$0xff] }
   0x5   :  { %114 = vmatpush.msra.mxu1 %v66_v3  ;;  %v47_v7 = vld [vmem:[%s628_s1 + $0x60] sm:$0xff]  ;;  %v46_v9 = vld [vmem:[%s628_s1 + $0x58] sm:$0xff]  ;;  %v45_v11 = vld [vmem:[%s628_s1 + $0x50] sm:$0xff] }
   0x6   :  { %92 = vmatpush.msra.mxu0 %v49_v2  ;;  %v63_v8 = vld [vmem:[%s628_s1 + $0xe0] sm:$0xff]  ;;  %v62_v10 = vld [vmem:[%s628_s1 + $0xd8] sm:$0xff]  ;;  %v61_v12 = vld [vmem:[%s628_s1 + $0xd0] sm:$0xff] }
   0x7   :  { %115 = vmatpush.msra.mxu1 %v65_v4  ;;  %v69_v13 = vld [vmem:[%s628_s1 + $0x110] sm:$0x1]  ;;  %v68_v14 = vld [vmem:[%s628_s1 + $0x108] sm:$0xff]  ;;  %v67_v17 = vld [vmem:[%s628_s1 + $0x100] sm:$0xff] }
   0x8   :  { %93 = vmatpush.msra.mxu0 %v48_v5  ;;  %v44_v15 = vld [vmem:[%s628_s1 + $0x48] sm:$0xff]  ;;  %347 = vmatpush.msk.msra.mxu2 %vm87_vm0, %v69_v13  ;;  %v43_v18 = vld [vmem:[%s628_s1 + $0x40] sm:$0xff]  ;;  %v42_v20 = vld [vmem:[%s628_s1 + $0x38] sm:$0xff] }
   0x9   :  { %116 = vmatpush.msra.mxu1 %v64_v6  ;;  %v60_v16 = vld [vmem:[%s628_s1 + $0xc8] sm:$0xff]  ;;  %v59_v19 = vld [vmem:[%s628_s1 + $0xc0] sm:$0xff]  ;;  %v72_v21 = vld [vmem:[%s627_s0 + $0x10] sm:$0xff] }
   0xa   :  { %94 = vmatpush.msra.mxu0 %v47_v7  ;;  %151 = vmatpush.msra.mxu2 %v68_v14  ;;  %v169_v22 = vld [vmem:[%s630_s3 + $0x38] sm:$0xff]  ;;  %v168_v24 = vld [vmem:[%s630_s3 + $0x30] sm:$0xff]  ;;  %v167_v25 = vld [vmem:[%s630_s3 + $0x28] sm:$0xff] }
   0xb   :  { %117 = vmatpush.msra.mxu1 %v63_v8  ;;  %v58_v23 = vld [vmem:[%s628_s1 + $0xb8] sm:$0xff]  ;;  %189 = vmatpush.msra.mxu3 %v169_v22  ;;  %v41_v26 = vld [vmem:[%s628_s1 + $0x30] sm:$0xff] }
   0xc   :  { %95 = vmatpush.msra.mxu0 %v46_v9  ;;  %152 = vmatpush.msra.mxu2 %v67_v17  ;;  %v57_v27 = vld [vmem:[%s628_s1 + $0xb0] sm:$0xff] }
   0xd   :  { %118 = vmatpush.msra.mxu1 %v62_v10  ;;  %348 = vmatmul.msk.f32.vlgmr.msra.gmra.mxu2 %vm80_vm1, %v72_v21 }
   0xe   :  { %96 = vmatpush.msra.mxu0 %v45_v11  ;;  %190 = vmatpush.msra.mxu3 %v168_v24 }
   0xf   :  { %119 = vmatpush.msra.mxu1 %v61_v12 }
  0x10   :  { %97 = vmatpush.msra.mxu0 %v44_v15 }
  0x11   :  { %120 = vmatpush.msra.mxu1 %v60_v16 }
  0x12   :  { %98 = vmatpush.msra.mxu0 %v43_v18 }
  0x13   :  { %121 = vmatpush.msra.mxu1 %v59_v19 }
  0x14   :  { %16 = vsyncpa [#allocation4], 0  ;;  %99 = vmatpush.msra.mxu0 %v42_v20  ;;  %v40_v28 = vld [vmem:[%s628_s1 + $0x28] sm:$0xff]  ;;  %191 = vmatpush.msra.mxu3 %v167_v25  ;;  %v39_v30 = vld [vmem:[%s628_s1 + $0x20] sm:$0xff]  ;;  %vm174_vm2 = vcmask 523264   ;;  %v393_v6 = vmov 0  }
  0x15   :  { %122 = vmatpush.msra.mxu1 %v58_v23  ;;  %v56_v29 = vld [vmem:[%s628_s1 + $0xa8] sm:$0xff]  ;;  %v55_v31 = vld [vmem:[%s628_s1 + $0xa0] sm:$0xff]  ;;  %v38_v33 = vld [vmem:[%s628_s1 + $0x18] sm:$0xff]  ;;  %359 = vset.pattern.permute.xlu1 %v393_v6  ;;  %vm214_vm3 = vcmask 261120   ;;  %vm292_vm4 = vcmask 130048   ;;  %s338_s12 = sshll.u32 %s636_s9, 4  ;;  %s339_s12 = int_to_ptr.hbm [resolvable:$true] %s338_s12 }
  0x16   :  { %100 = vmatpush.msra.mxu0 %v41_v26  ;;  %v75_v32 = vld [vmem:[%s627_s0 + $0x28] sm:$0xff]  ;;  %v54_v34 = vld [vmem:[%s628_s1 + $0x98] sm:$0xff]  ;;  %v37_v35 = vld [vmem:[%s628_s1 + $0x10] sm:$0xff]  ;;  %358 = vset.pattern.permute.xlu0 %v393_v6  ;;  %vm329_vm8 = vcmask 122880  }
  0x17   :  { %123 = vmatpush.msra.mxu1 %v57_v27  ;;  %v53_v36 = vld [vmem:[%s628_s1 + $0x90] sm:$0xff]  ;;  %349 = vmatmul.msk.f32.gmra.mxu2 %vm80_vm1, %v75_v32  ;;  %v36_v37 = vld [vmem:[%s628_s1 + $0x8] sm:$0xff]  ;;  %v35_v39 = vld [vmem:[%s628_s1] sm:$0xff] }
  0x18   :  { %101 = vmatpush.msra.mxu0 %v40_v28  ;;  %v52_v38 = vld [vmem:[%s628_s1 + $0x88] sm:$0xff]  ;;  %v51_v40 = vld [vmem:[%s628_s1 + $0x80] sm:$0xff]  ;;  %v73_v43 = vld [vmem:[%s627_s0 + $0x18] sm:$0xff] }
  0x19   :  { %124 = vmatpush.msra.mxu1 %v56_v29  ;;  %v70_v41 = vld [vmem:[%s627_s0] sm:$0xff]  ;;  %v71_v42 = vld [vmem:[%s627_s0 + $0x8] sm:$0xff]  ;;  %v165_v46 = vld [vmem:[%s630_s3 + $0x18] sm:$0xff] }
  0x1a   :  { %102 = vmatpush.msra.mxu0 %v39_v30  ;;  %v74_v44 = vld [vmem:[%s627_s0 + $0x20] sm:$0xff]  ;;  %v164_v47 = vld [vmem:[%s630_s3 + $0x10] sm:$0xff]  ;;  %v163_v48 = vld [vmem:[%s630_s3 + $0x8] sm:$0xff] }
  0x1b   :  { %125 = vmatpush.msra.mxu1 %v55_v31  ;;  %v166_v45 = vld [vmem:[%s630_s3 + $0x20] sm:$0xff]  ;;  %v209_v50 = vld [vmem:[%s632_s5 + $0x18] sm:$0xff]  ;;  %v208_v51 = vld [vmem:[%s632_s5 + $0x10] sm:$0xff] }
  0x1c   :  { %103 = vmatpush.msra.mxu0 %v38_v33  ;;  %192 = vmatpush.msra.mxu3 %v166_v45  ;;  %v162_v49 = vld [vmem:[%s630_s3] sm:$0xff]  ;;  %v207_v52 = vld [vmem:[%s632_s5 + $0x8] sm:$0xff] }
  0x1d   :  { %126 = vmatpush.msra.mxu1 %v54_v34  ;;  %233 = vmatpush.msrb.mxu2 %v209_v50  ;;  %v360_v53 = vld [vmem:[%s629_s2] ss:$0 sm:$0xff]  ;;  %v279_v15 = vld [vmem:[%s634_s7 + $0x8] sm:$0xff] }
  0x1e   :  { %104 = vmatpush.msra.mxu0 %v37_v35  ;;  %193 = vmatpush.msra.mxu3 %v165_v46  ;;  %v206_v4 = vld [vmem:[%s632_s5] sm:$0xff] }
  0x1f   :  { %127 = vmatpush.msra.mxu1 %v53_v36  ;;  %234 = vmatpush.msrb.mxu2 %v208_v51  ;;  %v302_v5 = vld [vmem:[#allocation2] sm:$0x1] }
  0x20   :  { %105 = vmatpush.msra.mxu0 %v36_v37  ;;  %194 = vmatpush.msra.mxu3 %v164_v47  ;;  %v361_v7 = vld [vmem:[%s631_s4] ss:$0 sm:$0xff] }
  0x21   :  { %128 = vmatpush.msra.mxu1 %v52_v38  ;;  %235 = vmatpush.msrb.mxu2 %v207_v52  ;;  %v278_v14 = vld [vmem:[%s634_s7] sm:$0xff] }
  0x22   :  { %106 = vmatpush.msra.mxu0 %v35_v39  ;;  %195 = vmatpush.msra.mxu3 %v163_v48  ;;  %v362_v16 = vld [vmem:[%s633_s6] ss:$0 sm:$0xff]  ;;  %s394_s6 = smov [#allocation3]  }
  0x23   :  { %129 = vmatpush.msra.mxu1 %v51_v40  ;;  %107 = vmatmul.f32.vlgmr.msra.gmra.mxu0 %v70_v41  ;;  %s336_s7 = sshll.u32 %s394_s6, 4  ;;  %s337_s7 = int_to_ptr.vmem [resolvable:$true] %s336_s7 }
  0x24   :  { %130 = vmatmul.f32.vlgmr.msra.gmra.mxu1 %v71_v42  ;;  %196 = vmatpush.msra.mxu3 %v162_v49 }
  0x25   :  { %236 = vmatpush.msrb.mxu2 %v206_v4  ;;  %305 = vperm.xlu1 %359, %v302_v5  }
  0x26   :  { %282 = vperm.xlu0 %358, %v278_v14  }
  0x2b   :  { %110 = vmatmul.f32.gmra.mxu0 %v73_v43 }
  0x2c   :  { %133 = vmatmul.f32.gmra.mxu1 %v74_v44 }
  0x2e   :  { %287 = vperm.xlu0 %358, %v279_v15  }
  0x90   :  { %v154_v54 = vpop.f32.mrf.mxu2 }
  0x97   :  { %v306_v23 = vpop.permute.xlu1 %305 }
  0x98   :  { %v283_v24 = vpop.permute.xlu0 %282  ;;  %v308_v38 = vperm.slane %v306_v23, 0 }
  0x9a   :  { %v157_v0 = vpop.f32.mrf.mxu2 }
  0xa0   :  { %v108_v55 = vpop.f32.mrf.mxu0  ;;  %v288_v27 = vpop.permute.xlu0 %287 }
  0xa1   :  { %v131_v56 = vpop.f32.mrf.mxu1  ;;  %v109_v57 = vadd.f32 %v360_v53, %v108_v55 }
  0xa3   :  { %v132_v58 = vadd.f32 %v131_v56, %v109_v57 }
  0xa5   :  { %v155_v59 = vadd.f32 %v154_v54, %v132_v58 }
  0xa7   :  { %v160_v60 = vmax.f32 %v155_v59, 0.0 }
  0xa8   :  { %v111_v61 = vpop.f32.mrf.mxu0 }
  0xa9   :  { %v134_v62 = vpop.f32.mrf.mxu1  ;;  %v112_v63 = vadd.f32 %v360_v53, %v111_v61  ;;  %350 = vmatmul.msk.f32.vlgmr.msra.gmra.mxu3 %vm174_vm2, %v160_v60 }
  0xab   :  { %v135_v1 = vadd.f32 %v134_v62, %v112_v63 }
  0xad   :  { %v158_v2 = vadd.f32 %v157_v0, %v135_v1 }
  0xaf   :  { %v161_v3 = vmax.f32 %v158_v2, 0.0 }
  0xb1   :  { %351 = vmatmul.msk.f32.gmra.mxu3 %vm174_vm2, %v161_v3 }
 0x12c   :  { %v198_v8 = vpop.f32.mrf.mxu3 }
 0x12d   :  { %v199_v9 = vadd.f32 %v361_v7, %v198_v8 }
 0x12f   :  { %v204_v10 = vmax.f32 %v199_v9, 0.0 }
 0x131   :  { %352 = vmatmul.msk.f32.vlgmr.msrb.gmra.mxu2 %vm214_vm3, %v204_v10 }
 0x134   :  { %v201_v11 = vpop.f32.mrf.mxu3 }
 0x135   :  { %v202_v12 = vadd.f32 %v361_v7, %v201_v11 }
 0x137   :  { %v205_v13 = vmax.f32 %v202_v12, 0.0 }
 0x139   :  { %353 = vmatmul.msk.f32.gmra.mxu2 %vm214_vm3, %v205_v13 }
 0x1b4   :  { %v238_v17 = vpop.f32.mrf.mxu2 }
 0x1b5   :  { %v239_v18 = vadd.f32 %v362_v16, %v238_v17 }
 0x1b7   :  { %v244_v19 = vmax.f32 %v239_v18, 0.0 }
 0x1b9   :  { %246 = vxpose.xlu1.b32.start [1/2] (short) (narrow) %v244_v19, 16 }
 0x1bc   :  { %v241_v20 = vpop.f32.mrf.mxu2 }
 0x1bd   :  { %v242_v21 = vadd.f32 %v362_v16, %v241_v20 }
 0x1bf   :  { %v245_v22 = vmax.f32 %v242_v21, 0.0 }
 0x1c1   :  { %247 = vxpose.xlu1.b32.end [2/2] (short) (narrow) %v245_v22, 16 }
 0x25d   :  { %v262_v25 = vpop.trf.xlu1 }
 0x25e   :  { %v290_v26 = vmul.f32 %v283_v24, %v262_v25 }
 0x260   :  { %v293_v30 = vsel %vm292_vm4, %v290_v26, 0.0 }
 0x265   :  { %v263_v28 = vpop.trf.xlu1 }
 0x266   :  { %v291_v29 = vmul.f32 %v288_v27, %v263_v28 }
 0x268   :  { %v294_v31 = vsel %vm292_vm4, %v291_v29, 0.0 }
 0x269   :  { %v295_v32 = vadd.f32 %v294_v31, %v293_v30 }
 0x26b   :  { %v296_v33 = vrot.slane %v295_v32, 4 }
 0x26d   :  { %v297_v34 = vadd.f32 %v296_v33, %v295_v32 }
 0x26f   :  { %v298_v35 = vrot.slane %v297_v34, 2 }
 0x271   :  { %v299_v36 = vadd.f32 %v298_v35, %v297_v34 }
 0x273   :  { %v300_v37 = vrot.slane %v299_v36, 1 }
 0x275   :  { %v301_v39 = vadd.f32 %v300_v37, %v299_v36 }
 0x277   :  { %v309_v40 = vadd.f32 %v308_v38, %v301_v39 }
 0x279   :  { %v354_v41 = vmul.f32 -1.442695, %v309_v40 }
 0x27b   :  { %363 = vpow2.f32 %v354_v41 }
 0x281   :  { %v364_v42 = vpop.eup %363 }
 0x282   :  { %v313_v43 = vadd.f32 1.0, %v364_v42 }
 0x284   :  { %365 = vrcp.f32 %v313_v43  ;;  %v325_v47 = vand.u32 2147483648, %v313_v43  ;;  %v323_v49 = vand.u32 2147483647, %v313_v43  ;;  %vm319_vm6 = vweird.f32 %v313_v43 }
 0x286   :  { %v326_v51 = vor.u32 1.1754944e-38, %v325_v47  ;;  %vm324_vm9 = vcmp.eq.f32.partialorder %v323_v49, 8.507059e+37 }
 0x28a   :  { %v366_v44 = vpop.eup %365 }
 0x28b   :  { %v315_v45 = vmul.f32 %v366_v44, %v313_v43  ;;  %vm320_vm5 = vweird.f32 %v366_v44 }
 0x28c   :  { %vm321_vm7 = vmor %vm319_vm6, %vm320_vm5 }
 0x28d   :  { %v316_v46 = vsub.f32 1.0, %v315_v45 }
 0x28f   :  { %v317_v48 = vmul.f32 %v366_v44, %v316_v46 }
 0x291   :  { %v318_v50 = vadd.f32 %v366_v44, %v317_v48 }
 0x293   :  { %v322_v52 = vsel %vm321_vm7, %v366_v44, %v318_v50 }
 0x294   :  { %v327_v53 = vsel %vm324_vm9, %v326_v51, %v322_v52 }
 0x295   :  { %330 = vst.msk [vmem:[#allocation3] sm:$0x1] %vm329_vm8, %v327_v53 }
 0x296   :  { %341 = dma.vmem_to_hbm [thread:$0]  %s337_s7, 16, %s339_s12, [#allocation4]  }
 0x297   :  { %391 = dma.done.wait [#allocation4], 16  }
 0x298   :  { %392 = vsyncadd [#allocation4], 4294967280 }
 0x299   :  { %346 = vsyncpa [#allocation4], 1 }

</bundles_post_ra>
